<compile_context>
chip_gen: v5e
topology: v5e:2x2
jax: 0.10.0
libtpu: 0.0.40
codegen_flags: <defaults>
</compile_context>

<pallas_src>
import jax
import jax.numpy as jnp
from jax.experimental import pallas as pl
from jax.experimental.pallas import tpu as pltpu

_LANE = 128
_SUBLANE = 8


def _round_up(x: int, m: int) -> int:
    return ((x + m - 1) // m) * m


def _linear_kernel(x_ref, m_ref, b_ref, o_ref):
    """o = x @ M + bias_row   (all blocks (8,128)-dense).

    x_ref: (bm, in_f*128)        VMEM  -- 128 batch items per row, features
                                          interleaved along lanes
    m_ref: (in_f*128, out_f*128) VMEM  -- kron(I_128, W^T), fetched once
    b_ref: (1, out_f*128)        VMEM  -- bias tiled per 128-item group
    o_ref: (bm, out_f*128)       VMEM  -- 128 batch items per row
    """
    o_ref[...] = (
        jnp.dot(
            x_ref[...],
            m_ref[...],
            preferred_element_type=jnp.float32,
            precision=jax.lax.Precision.HIGHEST,
        )
        + b_ref[...]
    ).astype(o_ref.dtype)


def fake_module_forward(x, weight, bias, *, max_block_rows: int = 4096):
    """Pallas equivalent of FakeModule.forward: y = x @ W^T + b.

    x:      (B, in_features)              float32
    weight: (out_features, in_features)   PyTorch nn.Linear layout
    bias:   (out_features,)
    returns (B, out_features)
    """
    B, in_f = x.shape
    out_f = weight.shape[0]

    # ---- lane-dense view of x: (rows, in_f*128). Row-major reshape => free. ----
    rows = pl.cdiv(B, _LANE)
    b_lanes = rows * _LANE
    xf = x.reshape(-1)
    if b_lanes != B:                       # granule-only padding (<128 items)
        xf = jnp.pad(xf, (0, (b_lanes - B) * in_f))
    x2 = xf.reshape(rows, in_f * _LANE)

    # ---- fold lane-deinterleave + W^T into one block-diagonal mixer ----
    # mixer[in_f*j + k, out_f*j + o] = W[o, k]; everything else 0.
    mixer = jnp.kron(jnp.eye(_LANE, dtype=x.dtype), weight.T.astype(x.dtype))
    bias_row = jnp.tile(bias.astype(x.dtype), _LANE).reshape(1, out_f * _LANE)

    # ---- block sizing: multiple of 8 sublanes, >=2 steps when possible ----
    if rows <= _SUBLANE:
        bm = rows                                   # full-dim exemption
    else:
        bm = min(max_block_rows, _round_up(pl.cdiv(rows, 2), _SUBLANE))
    grid = (pl.cdiv(rows, bm),)

    out2 = pl.pallas_call(
        _linear_kernel,
        out_shape=jax.ShapeDtypeStruct((rows, out_f * _LANE), x.dtype),
        grid=grid,
        in_specs=[
            pl.BlockSpec((bm, in_f * _LANE), lambda i: (i, 0)),          # x slab
            pl.BlockSpec((in_f * _LANE, out_f * _LANE), lambda i: (0, 0)),  # mixer (fetched once)
            pl.BlockSpec((1, out_f * _LANE), lambda i: (0, 0)),          # bias row
        ],
        out_specs=pl.BlockSpec((bm, out_f * _LANE), lambda i: (i, 0)),
        compiler_params=pltpu.CompilerParams(
            dimension_semantics=("parallel",),       # megacore shard on v7x
            vmem_limit_bytes=32 * 1024 * 1024,       # safe on v5e/v6e/v7x
        ),
    )(x2, mixer, bias_row)

    # Back to PyTorch convention (B, out_features): free row-major reshape,
    # plus a granule-only slice when B was not a multiple of 128.
    y = out2.reshape(b_lanes, out_f)
    return y if b_lanes == B else y[:B]


def _reference(x, weight, bias):
    return x @ weight.T + bias


if __name__ == "__main__":
    # Module defaults: in_features=2, out_features=1. Small demo batch of 8.
    in_features, out_features, batch = 2, 1, 8

    key = jax.random.PRNGKey(0)
    kx, kw, kb = jax.random.split(key, 3)

    # Deterministic init (mimic PyTorch uniform(-1/sqrt(in), 1/sqrt(in))).
    bound = 1.0 / (in_features ** 0.5)
    weight = jax.random.uniform(
        kw, (out_features, in_features), jnp.float32, -bound, bound)
    bias = jax.random.uniform(
        kb, (out_features,), jnp.float32, -bound, bound)

    x = jax.random.normal(kx, (batch, in_features), jnp.float32)

    y = fake_module_forward(x, weight, bias)
    jax.block_until_ready(y)
    assert y.shape == (batch, out_features)
    assert jnp.allclose(y, _reference(x, weight, bias), atol=1e-5, rtol=1e-5)

    # Extra small sanity checks: non-multiple-of-128 batch (granule padding)
    # and a multi-grid-step batch (2 blocks, ragged-free).
    for extra_batch in (300, 2048):
        xe = jax.random.normal(jax.random.PRNGKey(extra_batch),
                               (extra_batch, in_features), jnp.float32)
        ye = fake_module_forward(xe, weight, bias)
        jax.block_until_ready(ye)
        assert ye.shape == (extra_batch, out_features)
        assert jnp.allclose(ye, _reference(xe, weight, bias),
                            atol=1e-5, rtol=1e-5)

    print("KERNEL_OK")
</pallas_src>

<mosaic_0001>
module attributes {stable_mosaic.version = 11 : i64} {
  func.func @_linear_kernel(%arg0: i32, %arg1: memref<1x256xf32, #tpu.memory_space<vmem>>, %arg2: memref<256x128xf32, #tpu.memory_space<vmem>>, %arg3: memref<1x128xf32, #tpu.memory_space<vmem>>, %arg4: memref<1x128xf32, #tpu.memory_space<vmem>>) attributes {dimension_semantics = [#tpu.dimension_semantics<parallel>], iteration_bounds = array<i64: 1>, scalar_prefetch = 0 : i64, scratch_operands = 0 : i64, tpu.core_type = #tpu.core_type<tc>, window_params = [{transform_indices = @transform_0, window_bounds = array<i64: 1, 256>}, {pipeline_mode = #tpu.pipeline_mode<synchronous>, transform_indices = @transform_1, window_bounds = array<i64: 256, 128>}, {pipeline_mode = #tpu.pipeline_mode<synchronous>, transform_indices = @transform_2, window_bounds = array<i64: 1, 128>}, {transform_indices = @transform_3, window_bounds = array<i64: 1, 128>}]} {
    %c0 = arith.constant 0 : index
    %c0_0 = arith.constant 0 : index
    %0 = vector.load %arg1[%c0, %c0_0] : memref<1x256xf32, #tpu.memory_space<vmem>>, vector<1x256xf32>
    %c0_1 = arith.constant 0 : index
    %c0_2 = arith.constant 0 : index
    %1 = vector.load %arg2[%c0_1, %c0_2] : memref<256x128xf32, #tpu.memory_space<vmem>>, vector<256x128xf32>
    %cst = arith.constant dense<0.000000e+00> : vector<1x128xf32>
    %2 = tpu.matmul %0, %1, %cst {dimension_numbers = #tpu.dot_dimension_numbers<[1], [0], [0], [1], [0, 0, 1, 1], [], []>, precision = #tpu.contract_precision<fp32>} : vector<1x256xf32>, vector<256x128xf32>, vector<1x128xf32> -> vector<1x128xf32>
    %c0_3 = arith.constant 0 : index
    %c0_4 = arith.constant 0 : index
    %3 = vector.load %arg3[%c0_3, %c0_4] : memref<1x128xf32, #tpu.memory_space<vmem>>, vector<1x128xf32>
    %4 = arith.addf %2, %3 : vector<1x128xf32>
    %c0_5 = arith.constant 0 : index
    %c0_6 = arith.constant 0 : index
    %5 = vector.load %arg4[%c0_5, %c0_6] : memref<1x128xf32, #tpu.memory_space<vmem>>, vector<1x128xf32>
    tpu.vector_store %arg4[%c0_5, %c0_6], %4 {strides = array<i32>} : memref<1x128xf32, #tpu.memory_space<vmem>>, vector<1x128xf32>,
    return
  }
  func.func @transform_0(%arg0: i32) -> (i32, i32) {
    %c0_i32 = arith.constant 0 : i32
    %c0_i32_0 = arith.constant 0 : i32
    return %arg0, %c0_i32 : i32, i32
  }
  func.func @transform_1(%arg0: i32) -> (i32, i32) {
    %c0_i32 = arith.constant 0 : i32
    %c0_i32_0 = arith.constant 0 : i32
    %c0_i32_1 = arith.constant 0 : i32
    return %c0_i32, %c0_i32_0 : i32, i32
  }
  func.func @transform_2(%arg0: i32) -> (i32, i32) {
    %c0_i32 = arith.constant 0 : i32
    %c0_i32_0 = arith.constant 0 : i32
    %c0_i32_1 = arith.constant 0 : i32
    return %c0_i32, %c0_i32_0 : i32, i32
  }
  func.func @transform_3(%arg0: i32) -> (i32, i32) {
    %c0_i32 = arith.constant 0 : i32
    %c0_i32_0 = arith.constant 0 : i32
    return %arg0, %c0_i32 : i32, i32
  }
}

</mosaic_0001>

<bundles_post_ra>
// kernel: tpu_custom_call.1
= control target key start
LH: loop header
LB: loop body
LE: loop exit
PB: predicated region body
PF: predicated region fallthrough
CT: control target
= control target key end

     0   :  { %8 = vsyncpa [#allocation3], 0  ;;  %s1415_s0 = inlined_call_operand.hbm [shape: f32[1,256], index: 0, kind: input, shape index: {}]   ;;  %s1416_s1 = inlined_call_operand.hbm [shape: f32[256,128], index: 1, kind: input, shape index: {}]   ;;  %s1417_s2 = inlined_call_operand.vmem [shape: f32[1,128], index: 2, kind: input, shape index: {}]   ;;  %s1418_s3 = inlined_call_operand.hbm [shape: f32[1,128], index: 3, kind: output, shape index: {}]  }
   0x1   :  { %9 = vsyncpa [#allocation6], 0 }
   0x2   :  { %10 = vsyncpa [#allocation4], 0  ;;  %s16_s14 = sshll.u32 %s1415_s0, 4  ;;  %s868_s15 = smov [#allocation2]   ;;  %s17_s14 = int_to_ptr.hbm [resolvable:$true] %s16_s14 }
   0x3   :  { %s18_s16 = sshll.u32 %s868_s15, 4  ;;  %s26_s19 = sshll.u32 %s1416_s1, 4  ;;  %s19_s16 = int_to_ptr.vmem [resolvable:$true] %s18_s16  ;;  %s27_s19 = int_to_ptr.hbm [resolvable:$true] %s26_s19 }
   0x4   :  { %21 = dma.hbm_to_vmem [thread:$0]  %s17_s14, 32, %s19_s16, [#allocation3]  }
   0x5   :  { %s869_s20 = smov [#allocation5]   ;;  %s870_s22 = smov 128  }
   0x6   :  { %s28_s21 = sshll.u32 %s869_s20, 4  ;;  %s871_s23 = smov 8   ;;  %s29_s21 = int_to_ptr.vmem [resolvable:$true] %s28_s21 }
   0x7   :  { %34 = dma.hbm_to_vmem [thread:$0]  %s27_s19, 4096, %s29_s21, [#allocation6], %s870_s22, %s870_s22, %s871_s23  }
   0x8   :  { %862 = dma.done.wait [#allocation3], 32  }
   0x9   :  { %863 = vsyncadd [#allocation3], 4294967264 }
   0xa   :  { %864 = dma.done.wait [#allocation6], 4096  }
   0xb   :  { %865 = vsyncadd [#allocation6], 4294963200  ;;  %v61_v0 = vld [vmem:[#allocation5 + $0x78] sm:$0xff]  ;;  %v60_v1 = vld [vmem:[#allocation5 + $0x70] sm:$0xff]  ;;  %s774_s27 = sshll.u32 %s1418_s3, 4  ;;  %s775_s27 = int_to_ptr.hbm [resolvable:$true] %s774_s27 }
   0xc   :  { %v59_v2 = vld [vmem:[#allocation5 + $0x68] sm:$0xff]  ;;  %v899_v3 = vand.u32 4294901760, %v61_v0  ;;  %v901_v4 = vand.u32 4294901760, %v60_v1  ;;  %v58_v6 = vld [vmem:[#allocation5 + $0x60] sm:$0xff]  ;;  %v57_v7 = vld [vmem:[#allocation5 + $0x58] sm:$0xff] }
   0xd   :  { %v903_v5 = vand.u32 4294901760, %v59_v2  ;;  %v56_v8 = vld [vmem:[#allocation5 + $0x50] sm:$0xff]  ;;  %v905_v9 = vand.u32 4294901760, %v58_v6  ;;  %v907_v10 = vand.u32 4294901760, %v57_v7  ;;  %v55_v12 = vld [vmem:[#allocation5 + $0x48] sm:$0xff]  ;;  %v54_v13 = vld [vmem:[#allocation5 + $0x40] sm:$0xff] }
   0xe   :  { %v909_v11 = vand.u32 4294901760, %v56_v8  ;;  %85 = vmatpush.msra.mxu0 %v899_v3  ;;  %v913_v14 = vsub.f32 %v61_v0, %v899_v3  ;;  %v916_v15 = vsub.f32 %v60_v1, %v901_v4  ;;  %281 = vmatpush.msra.mxu3 %v899_v3  ;;  %v922_v17 = vand.u32 4294901760, %v55_v12  ;;  %v53_v21 = vld [vmem:[#allocation5 + $0x38] sm:$0xff]  ;;  %v52_v26 = vld [vmem:[#allocation5 + $0x30] sm:$0xff]  ;;  %v51_v36 = vld [vmem:[#allocation5 + $0x28] sm:$0xff] }
   0xf   :  { %v920_v16 = vsub.f32 %v59_v2, %v903_v5  ;;  %v925_v18 = vsub.f32 %v58_v6, %v905_v9  ;;  %v928_v19 = vsub.f32 %v57_v7, %v907_v10  ;;  %v930_v20 = vand.u32 4294901760, %v54_v13  ;;  %v50_v42 = vld [vmem:[#allocation5 + $0x20] sm:$0xff]  ;;  %v49_v47 = vld [vmem:[#allocation5 + $0x18] sm:$0xff]  ;;  %v48_v54 = vld [vmem:[#allocation5 + $0x10] sm:$0xff] }
  0x10   :  { %87 = vmatpush.msra.mxu0 %v901_v4  ;;  %228 = vmatpush.msra.mxu2 %v913_v14  ;;  %v127_v22 = vand.u32 4294901760, %v913_v14  ;;  %v1434_v23 = vand.u32 4294901760, %v916_v15  ;;  %v938_v25 = vsub.f32 %v56_v8, %v909_v11  ;;  %v944_v29 = vsub.f32 %v55_v12, %v922_v17  ;;  %v77_v59 = vld [vmem:[#allocation5 + $0xf8] sm:$0xff]  ;;  %v47_v61 = vld [vmem:[#allocation5 + $0x8] sm:$0xff]  ;;  %v76_v2 = vld [vmem:[#allocation5 + $0xf0] sm:$0xff] }
  0x11   :  { %v1432_v24 = vand.u32 4294901760, %v920_v16  ;;  %283 = vmatpush.msra.mxu3 %v901_v4  ;;  %v1430_v27 = vand.u32 4294901760, %v925_v18  ;;  %v1428_v28 = vand.u32 4294901760, %v928_v19  ;;  %v957_v33 = vand.u32 4294901760, %v53_v21  ;;  %v46_v7 = vld [vmem:[#allocation5] sm:$0xff] }
  0x12   :  { %89 = vmatpush.msra.mxu0 %v903_v5  ;;  %231 = vmatpush.msra.mxu2 %v916_v15  ;;  %v128_v30 = vsub.f32 %v913_v14, %v127_v22  ;;  %v134_v31 = vsub.f32 %v916_v15, %v1434_v23  ;;  %v960_v34 = vand.u32 4294901760, %v52_v26  ;;  %v963_v35 = vsub.f32 %v54_v13, %v930_v20  ;;  %v68_v23 = vld [vmem:[#allocation5 + $0xb0] sm:$0xff] }
  0x13   :  { %v140_v32 = vsub.f32 %v920_v16, %v1432_v24  ;;  %285 = vmatpush.msra.mxu3 %v903_v5  ;;  %v146_v39 = vsub.f32 %v925_v18, %v1430_v27  ;;  %v1426_v40 = vand.u32 4294901760, %v938_v25  ;;  %v152_v41 = vsub.f32 %v928_v19, %v1428_v28 }
  0x14   :  { %91 = vmatpush.msra.mxu0 %v905_v9  ;;  %v129_v37 = vand.u32 4294901760, %v128_v30  ;;  %234 = vmatpush.msra.mxu2 %v920_v16  ;;  %v135_v38 = vand.u32 4294901760, %v134_v31  ;;  %v976_v44 = vand.u32 4294901760, %v51_v36  ;;  %v1425_v45 = vand.u32 4294901760, %v944_v29 }
  0x15   :  { %287 = vmatpush.msra.mxu3 %v905_v9  ;;  %v141_v43 = vand.u32 4294901760, %v140_v32  ;;  %v980_v46 = vsub.f32 %v53_v21, %v957_v33  ;;  %v1424_v48 = vand.u32 4294901760, %v963_v35  ;;  %v147_v49 = vand.u32 4294901760, %v146_v39  ;;  %v75_v32 = vld [vmem:[#allocation5 + $0xe8] sm:$0xff] }
  0x16   :  { %93 = vmatpush.msra.mxu0 %v907_v10  ;;  %130 = vmatpush.msra.mxu1 %v129_v37  ;;  %v158_v50 = vsub.f32 %v938_v25, %v1426_v40  ;;  %v989_v51 = vand.u32 4294901760, %v50_v42  ;;  %v992_v52 = vsub.f32 %v52_v26, %v960_v34  ;;  %v996_v53 = vand.u32 4294901760, %v49_v47 }
  0x17   :  { %237 = vmatpush.msra.mxu2 %v925_v18  ;;  %289 = vmatpush.msra.mxu3 %v907_v10  ;;  %v153_v55 = vand.u32 4294901760, %v152_v41  ;;  %v164_v56 = vsub.f32 %v944_v29, %v1425_v45  ;;  %v1423_v57 = vand.u32 4294901760, %v980_v46  ;;  %v1004_v58 = vsub.f32 %v51_v36, %v976_v44  ;;  %v74_v41 = vld [vmem:[#allocation5 + $0xe0] sm:$0xff] }
  0x18   :  { %95 = vmatpush.msra.mxu0 %v909_v11  ;;  %136 = vmatpush.msra.mxu1 %v135_v38  ;;  %v170_v60 = vsub.f32 %v963_v35, %v1424_v48  ;;  %v159_v62 = vand.u32 4294901760, %v158_v50  ;;  %v1012_v63 = vand.u32 4294901760, %v48_v54  ;;  %v1422_v0 = vand.u32 4294901760, %v992_v52  ;;  %v70_v45 = vld [vmem:[#allocation5 + $0xc0] sm:$0xff] }
  0x19   :  { %240 = vmatpush.msra.mxu2 %v928_v19  ;;  %291 = vmatpush.msra.mxu3 %v909_v11  ;;  %v1016_v1 = vsub.f32 %v50_v42, %v989_v51  ;;  %v1021_v6 = vsub.f32 %v49_v47, %v996_v53  ;;  %v1023_v8 = vand.u32 4294901760, %v77_v59  ;;  %v165_v12 = vand.u32 4294901760, %v164_v56 }
  0x1a   :  { %97 = vmatpush.msra.mxu0 %v922_v17  ;;  %142 = vmatpush.msra.mxu1 %v141_v43  ;;  %v176_v13 = vsub.f32 %v980_v46, %v1423_v57  ;;  %v1029_v21 = vand.u32 4294901760, %v47_v61  ;;  %v1420_v26 = vand.u32 4294901760, %v1004_v58  ;;  %v171_v30 = vand.u32 4294901760, %v170_v60  ;;  %v71_v57 = vld [vmem:[#allocation5 + $0xc8] sm:$0xff] }
  0x1b   :  { %243 = vmatpush.msra.mxu2 %v938_v25  ;;  %293 = vmatpush.msra.mxu3 %v922_v17  ;;  %1439 = vst [vmem:[#allocation11_spill] sm:$0xff] %v1023_v8  ;;  %v1034_v31 = vand.u32 4294901760, %v76_v2  ;;  %v182_v36 = vsub.f32 %v992_v52, %v1422_v0  ;;  %v1040_v37 = vand.u32 4294901760, %v46_v7  ;;  %v1419_v38 = vand.u32 4294901760, %v1016_v1 }
  0x1c   :  { %99 = vmatpush.msra.mxu0 %v930_v20  ;;  %148 = vmatpush.msra.mxu1 %v147_v49  ;;  %v1044_v39 = vsub.f32 %v48_v54, %v1012_v63  ;;  %v1421_v42 = vand.u32 4294901760, %v1021_v6  ;;  %v1050_v43 = vsub.f32 %v77_v59, %v1023_v8  ;;  %v177_v47 = vand.u32 4294901760, %v176_v13  ;;  %v73_v59 = vld [vmem:[#allocation5 + $0xd8] sm:$0xff] }
  0x1d   :  { %246 = vmatpush.msra.mxu2 %v944_v29  ;;  %295 = vmatpush.msra.mxu3 %v930_v20  ;;  %1440 = vst [vmem:[#allocation12_spill] sm:$0xff] %v1040_v37  ;;  %v188_v49 = vsub.f32 %v1004_v58, %v1420_v26  ;;  %v1057_v50 = vsub.f32 %v47_v61, %v1029_v21  ;;  %v1059_v54 = vand.u32 4294901760, %v75_v32  ;;  %v1066_v56 = vand.u32 4294901760, %v74_v41 }
  0x1e   :  { %101 = vmatpush.msra.mxu0 %v957_v33  ;;  %154 = vmatpush.msra.mxu1 %v153_v55  ;;  %v1064_v55 = vsub.f32 %v76_v2, %v1034_v31  ;;  %v183_v60 = vand.u32 4294901760, %v182_v36  ;;  %v194_v61 = vsub.f32 %v1016_v1, %v1419_v38  ;;  %v200_v2 = vsub.f32 %v1021_v6, %v1421_v42 }
  0x1f   :  { %249 = vmatpush.msra.mxu2 %v963_v35  ;;  %297 = vmatpush.msra.mxu3 %v957_v33  ;;  %v1429_v13 = vand.u32 4294901760, %v1050_v43  ;;  %v189_v36 = vand.u32 4294901760, %v188_v49  ;;  %v1431_v38 = vand.u32 4294901760, %v1057_v50  ;;  %v1087_v26 = vand.u32 4294901760, %v73_v59 }
  0x20   :  { %103 = vmatpush.msra.mxu0 %v960_v34  ;;  %160 = vmatpush.msra.mxu1 %v159_v62  ;;  %v1427_v62 = vand.u32 4294901760, %v1044_v39  ;;  %v1433_v42 = vand.u32 4294901760, %v1064_v55  ;;  %v1093_v0 = vsub.f32 %v74_v41, %v1066_v56  ;;  %v201_v40 = vand.u32 4294901760, %v200_v2  ;;  %v69_v2 = vld [vmem:[#allocation5 + $0xb8] sm:$0xff] }
  0x21   :  { %252 = vmatpush.msra.mxu2 %v980_v46  ;;  %299 = vmatpush.msra.mxu3 %v960_v34  ;;  %v469_v41 = vsub.f32 %v1050_v43, %v1429_v13  ;;  %v1115_v28 = vand.u32 4294901760, %v71_v57  ;;  %v1123_v27 = vand.u32 4294901760, %v70_v45  ;;  %v1135_v13 = vand.u32 4294901760, %v69_v2 }
  0x22   :  { %105 = vmatpush.msra.mxu0 %v976_v44  ;;  %166 = vmatpush.msra.mxu1 %v165_v12  ;;  %v1074_v12 = vsub.f32 %v46_v7, %v1040_v37  ;;  %v1085_v7 = vsub.f32 %v75_v32, %v1059_v54  ;;  %v206_v32 = vsub.f32 %v1044_v39, %v1427_v62  ;;  %v1442_v14 = vand.u32 4294901760, %v916_v15 }
  0x23   :  { %255 = vmatpush.msra.mxu2 %v992_v52  ;;  %301 = vmatpush.msra.mxu3 %v976_v44  ;;  %v1113_v62 = vsub.f32 %v73_v59, %v1087_v26  ;;  %v1444_v15 = vand.u32 4294901760, %v920_v16  ;;  %v1446_v16 = vand.u32 4294901760, %v925_v18 }
  0x24   :  { %107 = vmatpush.msra.mxu0 %v989_v51  ;;  %172 = vmatpush.msra.mxu1 %v171_v30  ;;  %v72_v30 = vld [vmem:[#allocation5 + $0xd0] sm:$0xff]  ;;  %v1435_v49 = vand.u32 4294901760, %v1074_v12  ;;  %v207_v59 = vand.u32 4294901760, %v206_v32 }
  0x25   :  { %258 = vmatpush.msra.mxu2 %v1004_v58  ;;  %303 = vmatpush.msra.mxu3 %v989_v51  ;;  %v1100_v48 = vand.u32 4294901760, %v72_v30 }
  0x26   :  { %109 = vmatpush.msra.mxu0 %v996_v53  ;;  %178 = vmatpush.msra.mxu1 %v177_v47  ;;  %v195_v47 = vand.u32 4294901760, %v194_v61 }
  0x27   :  { %261 = vmatpush.msra.mxu2 %v1016_v1  ;;  %305 = vmatpush.msra.mxu3 %v996_v53  ;;  %v1130_v24 = vsub.f32 %v72_v30, %v1100_v48  ;;  %v1156_v30 = vand.u32 4294901760, %v68_v23 }
  0x28   :  { %111 = vmatpush.msra.mxu0 %v1012_v63  ;;  %184 = vmatpush.msra.mxu1 %v183_v60  ;;  %v212_v60 = vsub.f32 %v1057_v50, %v1431_v38  ;;  %v218_v38 = vsub.f32 %v1074_v12, %v1435_v49  ;;  %v1143_v49 = vsub.f32 %v71_v57, %v1115_v28 }
  0x29   :  { %264 = vmatpush.msra.mxu2 %v1021_v6  ;;  %307 = vmatpush.msra.mxu3 %v1012_v63 }
  0x2a   :  { %113 = vmatpush.msra.mxu0 %v1029_v21  ;;  %190 = vmatpush.msra.mxu1 %v189_v36  ;;  %v475_v36 = vsub.f32 %v1064_v55, %v1433_v42  ;;  %v470_v42 = vand.u32 4294901760, %v469_v41  ;;  %v213_v61 = vand.u32 4294901760, %v212_v60  ;;  %v1152_v60 = vsub.f32 %v70_v45, %v1123_v27 }
  0x2b   :  { %267 = vmatpush.msra.mxu2 %v1044_v39  ;;  %309 = vmatpush.msra.mxu3 %v1029_v21 }
  0x2c   :  { %115 = vmatpush.msra.mxu0 %v1040_v37  ;;  %196 = vmatpush.msra.mxu1 %v195_v47  ;;  %v1441_v47 = vand.u32 4294901760, %v1085_v7 }
  0x2d   :  { %270 = vmatpush.msra.mxu2 %v1057_v50  ;;  %311 = vmatpush.msra.mxu3 %v1040_v37  ;;  %v67_v37 = vld [vmem:[#allocation5 + $0xa8] sm:$0xff] }
  0x2e   :  { %322 = vmatpush.msrb.mxu0 %v127_v22  ;;  %202 = vmatpush.msra.mxu1 %v201_v40  ;;  %v481_v32 = vsub.f32 %v1085_v7, %v1441_v47  ;;  %v476_v22 = vand.u32 4294901760, %v475_v36  ;;  %v1443_v40 = vand.u32 4294901760, %v1093_v0  ;;  %v219_v47 = vand.u32 4294901760, %v218_v38 }
  0x2f   :  { %273 = vmatpush.msra.mxu2 %v1074_v12  ;;  %471 = vmatpush.msrb.mxu3 %v470_v42  ;;  %v1161_v36 = vsub.f32 %v69_v2, %v1135_v13  ;;  %v1445_v38 = vand.u32 4294901760, %v1113_v62 }
  0x30   :  { %326 = vmatpush.msrb.mxu0 %v1442_v14  ;;  %v487_v41 = vsub.f32 %v1093_v0, %v1443_v40  ;;  %208 = vmatpush.msra.mxu1 %v207_v59  ;;  %v66_v14 = vld [vmem:[#allocation5 + $0xa0] sm:$0xff]  ;;  %v1163_v40 = vld [vmem:[#allocation2] sm:$0x3]  ;;  %v482_v45 = vand.u32 4294901760, %v481_v32 }
  0x31   :  { %426 = vmatpush.msrb.mxu2 %v1023_v8  ;;  %v493_v59 = vsub.f32 %v1113_v62, %v1445_v38  ;;  %v1170_v8 = vand.u32 4294901760, %v67_v37  ;;  %477 = vmatpush.msrb.mxu3 %v476_v22  ;;  %v1180_v38 = vsub.f32 %v68_v23, %v1156_v30  ;;  %v1182_v57 = vand.u32 4294901760, %v66_v14 }
  0x32   :  { %330 = vmatpush.msrb.mxu0 %v1444_v15  ;;  %214 = vmatpush.msra.mxu1 %v213_v61  ;;  %v488_v42 = vand.u32 4294901760, %v487_v41  ;;  %v65_v15 = vld [vmem:[#allocation5 + $0x98] sm:$0xff]  ;;  %v1447_v61 = vand.u32 4294901760, %v1130_v24  ;;  %v80_v18 = vperm.slane %v1163_v40, 0  ;;  %v1448_v22 = vand.u32 4294901760, %v928_v19 }
  0x33   :  { %428 = vmatpush.msrb.mxu2 %v1034_v31  ;;  %483 = vmatpush.msrb.mxu3 %v482_v45  ;;  %v1196_v2 = vand.u32 4294901760, %v65_v15  ;;  %v1450_v19 = vand.u32 4294901760, %v938_v25  ;;  %v64_v45 = vld [vmem:[#allocation5 + $0x90] sm:$0xff]  ;;  %v1452_v25 = vand.u32 4294901760, %v944_v29  ;;  %v1454_v29 = vand.u32 4294901760, %v963_v35 }
  0x34   :  { %334 = vmatpush.msrb.mxu0 %v1446_v16  ;;  %220 = vmatpush.msra.mxu1 %v219_v47  ;;  %v499_v32 = vsub.f32 %v1130_v24, %v1447_v61  ;;  %v494_v47 = vand.u32 4294901760, %v493_v59  ;;  %v1449_v16 = vand.u32 4294901760, %v1143_v49  ;;  %v1194_v61 = vsub.f32 %v67_v37, %v1170_v8 }
  0x35   :  { %430 = vmatpush.msrb.mxu2 %v1059_v54  ;;  %489 = vmatpush.msrb.mxu3 %v488_v42  ;;  %v1207_v37 = vsub.f32 %v66_v14, %v1182_v57  ;;  %v1209_v41 = vand.u32 4294901760, %v80_v18  ;;  %v1219_v14 = vand.u32 4294901760, %v64_v45  ;;  %v1456_v35 = vand.u32 4294901760, %v980_v46 }
  0x36   :  { %338 = vmatpush.msrb.mxu0 %v1448_v22  ;;  %389 = vmatpush.msrb.mxu1 %v899_v3  ;;  %v505_v23 = vsub.f32 %v1143_v49, %v1449_v16  ;;  %v1451_v3 = vand.u32 4294901760, %v1152_v60  ;;  %v500_v59 = vand.u32 4294901760, %v499_v32  ;;  %v1222_v16 = vsub.f32 %v65_v15, %v1196_v2 }
  0x37   :  { %432 = vmatpush.msrb.mxu2 %v1066_v56  ;;  %495 = vmatpush.msrb.mxu3 %v494_v47  ;;  %v1455_v47 = vand.u32 4294901760, %v1180_v38  ;;  %v1233_v32 = vsub.f32 %v80_v18, %v1209_v41  ;;  %v1246_v18 = vsub.f32 %v64_v45, %v1219_v14  ;;  %v1458_v46 = vand.u32 4294901760, %v992_v52 }
  0x38   :  { %342 = vmatpush.msrb.mxu0 %v1450_v19  ;;  %391 = vmatpush.msrb.mxu1 %v901_v4  ;;  %v511_v22 = vsub.f32 %v1152_v60, %v1451_v3  ;;  %v1453_v4 = vand.u32 4294901760, %v1161_v36  ;;  %v63_v3 = vld [vmem:[#allocation5 + $0x88] sm:$0xff]  ;;  %v506_v42 = vand.u32 4294901760, %v505_v23 }
  0x39   :  { %434 = vmatpush.msrb.mxu2 %v1087_v26  ;;  %501 = vmatpush.msrb.mxu3 %v500_v59  ;;  %v523_v23 = vsub.f32 %v1180_v38, %v1455_v47  ;;  %v1235_v15 = vand.u32 4294901760, %v63_v3 }
  0x3a   :  { %346 = vmatpush.msrb.mxu0 %v1452_v25  ;;  %393 = vmatpush.msrb.mxu1 %v903_v5  ;;  %v517_v19 = vsub.f32 %v1161_v36, %v1453_v4  ;;  %v512_v5 = vand.u32 4294901760, %v511_v22  ;;  %v62_v25 = vld [vmem:[#allocation5 + $0x80] sm:$0xff]  ;;  %v534_v4 = vand.u32 4294901760, %v1207_v37  ;;  %v1457_v22 = vand.u32 4294901760, %v1194_v61 }
  0x3b   :  { %436 = vmatpush.msrb.mxu2 %v1100_v48  ;;  %507 = vmatpush.msrb.mxu3 %v506_v42  ;;  %v1248_v47 = vand.u32 4294901760, %v62_v25  ;;  %v118_v42 = vand.u32 4294901760, %v1233_v32  ;;  %v1259_v45 = vsub.f32 %v63_v3, %v1235_v15 }
  0x3c   :  { %350 = vmatpush.msrb.mxu0 %v1454_v29  ;;  %395 = vmatpush.msrb.mxu1 %v905_v9  ;;  %v518_v9 = vand.u32 4294901760, %v517_v19  ;;  %v529_v59 = vsub.f32 %v1194_v61, %v1457_v22  ;;  %v540_v29 = vand.u32 4294901760, %v1222_v16  ;;  %v535_v19 = vsub.f32 %v1207_v37, %v534_v4 }
  0x3d   :  { %438 = vmatpush.msrb.mxu2 %v1115_v28  ;;  %513 = vmatpush.msrb.mxu3 %v512_v5  ;;  %v1271_v3 = vsub.f32 %v62_v25, %v1248_v47  ;;  %v1461_v22 = vand.u32 4294901760, %v1021_v6 }
  0x3e   :  { %354 = vmatpush.msrb.mxu0 %v1456_v35  ;;  %397 = vmatpush.msrb.mxu1 %v907_v10  ;;  %v524_v10 = vand.u32 4294901760, %v523_v23  ;;  %v1459_v35 = vand.u32 4294901760, %v1004_v58  ;;  %v530_v52 = vand.u32 4294901760, %v529_v59  ;;  %v541_v5 = vsub.f32 %v1222_v16, %v540_v29 }
  0x3f   :  { %440 = vmatpush.msrb.mxu2 %v1123_v27  ;;  %519 = vmatpush.msrb.mxu3 %v518_v9  ;;  %v546_v23 = vand.u32 4294901760, %v1246_v18  ;;  %v1460_v58 = vand.u32 4294901760, %v1016_v1  ;;  %v552_v9 = vand.u32 4294901760, %v1259_v45  ;;  %v558_v59 = vand.u32 4294901760, %v1271_v3 }
  0x40   :  { %358 = vmatpush.msrb.mxu0 %v1458_v46  ;;  %399 = vmatpush.msrb.mxu1 %v909_v11  ;;  %v81_v11 = vperm.slane %v1163_v40, 1  ;;  %v119_v40 = vsub.f32 %v1233_v32, %v118_v42  ;;  %v542_v1 = vand.u32 4294901760, %v541_v5  ;;  %v1462_v46 = vand.u32 4294901760, %v1044_v39 }
  0x41   :  { %442 = vmatpush.msrb.mxu2 %v1135_v13  ;;  %525 = vmatpush.msrb.mxu3 %v524_v10  ;;  %v553_v6 = vsub.f32 %v1259_v45, %v552_v9  ;;  %v1463_v10 = vand.u32 4294901760, %v1057_v50 }
  0x42   :  { %362 = vmatpush.msrb.mxu0 %v1459_v35  ;;  %401 = vmatpush.msrb.mxu1 %v922_v17  ;;  %v536_v17 = vand.u32 4294901760, %v535_v19  ;;  %v1283_v25 = vand.u32 4294901760, %v81_v11  ;;  %v1464_v35 = vand.u32 4294901760, %v1074_v12  ;;  %v1467_v12 = vld [vmem:[#allocation11_spill] sm:$0xff] }
  0x43   :  { %444 = vmatpush.msrb.mxu2 %v1156_v30  ;;  %531 = vmatpush.msrb.mxu3 %v530_v52 }
  0x44   :  { %366 = vmatpush.msrb.mxu0 %v1460_v58  ;;  %403 = vmatpush.msrb.mxu1 %v930_v20  ;;  %v547_v20 = vsub.f32 %v1246_v18, %v546_v23  ;;  %v1304_v19 = vsub.f32 %v81_v11, %v1283_v25 }
  0x45   :  { %446 = vmatpush.msrb.mxu2 %v1170_v8  ;;  %537 = vmatpush.msrb.mxu3 %v536_v17 }
  0x46   :  { %370 = vmatpush.msrb.mxu0 %v1461_v22  ;;  %405 = vmatpush.msrb.mxu1 %v957_v33  ;;  %v120_v33 = vand.u32 4294901760, %v119_v40  ;;  %v548_v39 = vand.u32 4294901760, %v547_v20  ;;  %v459_v11 = vand.u32 4294901760, %v1304_v19 }
  0x47   :  { %448 = vmatpush.msrb.mxu2 %v1182_v57  ;;  %543 = vmatpush.msrb.mxu3 %v542_v1 }
  0x48   :  { %374 = vmatpush.msrb.mxu0 %v1462_v46  ;;  %407 = vmatpush.msrb.mxu1 %v960_v34  ;;  %v559_v34 = vsub.f32 %v1271_v3, %v558_v59 }
  0x49   :  { %450 = vmatpush.msrb.mxu2 %v1196_v2  ;;  %121 = vmatmul.f32.vlgmr.msra.gmra.mxu0 %v120_v33 }
  0x4a   :  { %378 = vmatpush.msrb.mxu0 %v1463_v10  ;;  %409 = vmatpush.msrb.mxu1 %v976_v44  ;;  %v554_v44 = vand.u32 4294901760, %v553_v6  ;;  %v560_v50 = vand.u32 4294901760, %v559_v34 }
  0x4b   :  { %452 = vmatpush.msrb.mxu2 %v1219_v14  ;;  %549 = vmatpush.msrb.mxu3 %v548_v39 }
  0x4c   :  { %382 = vmatpush.msrb.mxu0 %v1464_v35  ;;  %411 = vmatpush.msrb.mxu1 %v989_v51  ;;  %v1465_v51 = vand.u32 4294901760, %v1050_v43 }
  0x4d   :  { %454 = vmatpush.msrb.mxu2 %v1235_v15  ;;  %555 = vmatpush.msrb.mxu3 %v554_v44 }
  0x4e   :  { %569 = vmatpush.msra.mxu0 %v1050_v43  ;;  %413 = vmatpush.msrb.mxu1 %v996_v53  ;;  %v460_v53 = vsub.f32 %v1304_v19, %v459_v11 }
  0x4f   :  { %456 = vmatpush.msrb.mxu2 %v1248_v47  ;;  %561 = vmatpush.msrb.mxu3 %v560_v50 }
  0x50   :  { %572 = vmatpush.msra.mxu0 %v1064_v55  ;;  %415 = vmatpush.msrb.mxu1 %v1012_v63  ;;  %v1466_v63 = vand.u32 4294901760, %v1064_v55  ;;  %v461_v43 = vand.u32 4294901760, %v460_v53  ;;  %v1470_v55 = vand.u32 4294901760, %v1093_v0 }
  0x51   :  { %276 = vmatmul.f32.vlgmr.msra.gmra.mxu2 %v1233_v32  ;;  %315 = vmatmul.f32.vlgmr.msra.gmra.mxu3 %v118_v42  ;;  %v1468_v32 = vld [vmem:[#allocation12_spill] sm:$0xff] }
  0x52   :  { %575 = vmatpush.msra.mxu0 %v1085_v7  ;;  %663 = vmatpush.msra.mxu2 %v1465_v51 }
  0x53   :  { %417 = vmatpush.msrb.mxu1 %v1029_v21  ;;  %730 = vmatpush.msra.mxu3 %v1467_v12  ;;  %v1469_v21 = vand.u32 4294901760, %v1085_v7  ;;  %v1471_v7 = vand.u32 4294901760, %v1113_v62 }
  0x54   :  { %578 = vmatpush.msra.mxu0 %v1093_v0  ;;  %667 = vmatpush.msra.mxu2 %v1466_v63  ;;  %v1472_v0 = vand.u32 4294901760, %v1130_v24 }
  0x55   :  { %419 = vmatpush.msrb.mxu1 %v1468_v32  ;;  %732 = vmatpush.msra.mxu3 %v1034_v31 }
  0x56   :  { %581 = vmatpush.msra.mxu0 %v1113_v62  ;;  %222 = vmatmul.f32.vlgmr.msra.gmra.mxu1 %v1209_v41 }
  0x57   :  { %671 = vmatpush.msra.mxu2 %v1469_v21  ;;  %622 = vmatpush.msra.mxu1 %v1467_v12 }
  0x58   :  { %584 = vmatpush.msra.mxu0 %v1130_v24  ;;  %734 = vmatpush.msra.mxu3 %v1059_v54  ;;  %v1474_v24 = vand.u32 4294901760, %v1152_v60 }
  0x59   :  { %675 = vmatpush.msra.mxu2 %v1470_v55  ;;  %624 = vmatpush.msra.mxu1 %v1034_v31  ;;  %v1473_v31 = vand.u32 4294901760, %v1143_v49 }
  0x5a   :  { %462 = vmatmul.f32.vlgmr.msrb.gmra.mxu2 %v461_v43  ;;  %587 = vmatpush.msra.mxu0 %v1143_v49 }
  0x5b   :  { %626 = vmatpush.msra.mxu1 %v1059_v54  ;;  %679 = vmatpush.msra.mxu2 %v1471_v7 }
  0x5c   :  { %736 = vmatpush.msra.mxu3 %v1066_v56  ;;  %384 = vmatmul.f32.vlgmr.msrb.gmra.mxu0 %v1209_v41 }
  0x5d   :  { %563 = vmatmul.f32.vlgmr.msrb.gmra.mxu3 %v1283_v25  ;;  %590 = vmatpush.msra.mxu0 %v1152_v60 }
  0x5e   :  { %628 = vmatpush.msra.mxu1 %v1066_v56  ;;  %683 = vmatpush.msra.mxu2 %v1472_v0 }
  0x5f   :  { %738 = vmatpush.msra.mxu3 %v1087_v26  ;;  %421 = vmatmul.f32.vlgmr.msrb.gmra.mxu1 %v1209_v41 }
  0x60   :  { %593 = vmatpush.msra.mxu0 %v1161_v36  ;;  %630 = vmatpush.msra.mxu1 %v1087_v26  ;;  %v1475_v26 = vand.u32 4294901760, %v1161_v36 }
  0x61   :  { %687 = vmatpush.msra.mxu2 %v1473_v31  ;;  %740 = vmatpush.msra.mxu3 %v1100_v48 }
  0x62   :  { %596 = vmatpush.msra.mxu0 %v1180_v38  ;;  %632 = vmatpush.msra.mxu1 %v1100_v48  ;;  %v1476_v48 = vand.u32 4294901760, %v1180_v38 }
  0x63   :  { %691 = vmatpush.msra.mxu2 %v1474_v24  ;;  %742 = vmatpush.msra.mxu3 %v1115_v28 }
  0x64   :  { %599 = vmatpush.msra.mxu0 %v1194_v61  ;;  %634 = vmatpush.msra.mxu1 %v1115_v28  ;;  %v1477_v28 = vand.u32 4294901760, %v1194_v61 }
  0x65   :  { %695 = vmatpush.msra.mxu2 %v1475_v26  ;;  %744 = vmatpush.msra.mxu3 %v1123_v27 }
  0x66   :  { %602 = vmatpush.msra.mxu0 %v1207_v37  ;;  %636 = vmatpush.msra.mxu1 %v1123_v27  ;;  %v78_v27 = vld [vmem:[%s1417_s2] sm:$0x1]  ;;  %s872_s2 = smov [#allocation7]  }
  0x67   :  { %699 = vmatpush.msra.mxu2 %v1476_v48  ;;  %746 = vmatpush.msra.mxu3 %v1135_v13  ;;  %s772_s24 = sshll.u32 %s872_s2, 4  ;;  %s773_s24 = int_to_ptr.vmem [resolvable:$true] %s772_s24 }
  0x68   :  { %605 = vmatpush.msra.mxu0 %v1222_v16  ;;  %638 = vmatpush.msra.mxu1 %v1135_v13 }
  0x69   :  { %703 = vmatpush.msra.mxu2 %v1477_v28  ;;  %748 = vmatpush.msra.mxu3 %v1156_v30 }
  0x6a   :  { %608 = vmatpush.msra.mxu0 %v1246_v18  ;;  %640 = vmatpush.msra.mxu1 %v1156_v30 }
  0x6b   :  { %707 = vmatpush.msra.mxu2 %v534_v4  ;;  %750 = vmatpush.msra.mxu3 %v1170_v8 }
  0x6c   :  { %611 = vmatpush.msra.mxu0 %v1259_v45  ;;  %642 = vmatpush.msra.mxu1 %v1170_v8 }
  0x6d   :  { %711 = vmatpush.msra.mxu2 %v540_v29  ;;  %752 = vmatpush.msra.mxu3 %v1182_v57 }
  0x6e   :  { %614 = vmatpush.msra.mxu0 %v1271_v3  ;;  %644 = vmatpush.msra.mxu1 %v1182_v57 }
  0x6f   :  { %715 = vmatpush.msra.mxu2 %v546_v23  ;;  %754 = vmatpush.msra.mxu3 %v1196_v2 }
  0x70   :  { %617 = vmatmul.f32.vlgmr.msra.gmra.mxu0 %v1304_v19  ;;  %646 = vmatpush.msra.mxu1 %v1196_v2 }
  0x71   :  { %719 = vmatpush.msra.mxu2 %v552_v9  ;;  %756 = vmatpush.msra.mxu3 %v1219_v14 }
  0x72   :  { %648 = vmatpush.msra.mxu1 %v1219_v14 }
  0x73   :  { %723 = vmatpush.msra.mxu2 %v558_v59  ;;  %758 = vmatpush.msra.mxu3 %v1235_v15 }
  0x74   :  { %725 = vmatmul.f32.vlgmr.msra.gmra.mxu2 %v1283_v25  ;;  %650 = vmatpush.msra.mxu1 %v1235_v15 }
  0x75   :  { %760 = vmatpush.msra.mxu3 %v1248_v47 }
  0x76   :  { %762 = vmatmul.f32.vlgmr.msra.gmra.mxu3 %v1283_v25  ;;  %652 = vmatpush.msra.mxu1 %v1248_v47 }
  0x77   :  { %656 = vmatmul.f32.vlgmr.msra.gmra.mxu1 %v459_v11 }
  0xc6   :  { %v122_v8 = vpop.f32.mrf.mxu0 }
  0xc7   :  { %v123_v54 = vadd.f32 %v122_v8, %v78_v27 }
  0xd3   :  { %v223_v56 = vpop.f32.mrf.mxu1 }
  0xd4   :  { %v224_v62 = vadd.f32 %v223_v56, %v123_v54  ;;  %v277_v13 = vpop.f32.mrf.mxu2  ;;  %v316_v30 = vpop.f32.mrf.mxu3 }
  0xd6   :  { %v278_v49 = vadd.f32 %v277_v13, %v224_v62 }
  0xd8   :  { %v317_v60 = vadd.f32 %v316_v30, %v278_v49 }
  0xd9   :  { %v385_v57 = vpop.f32.mrf.mxu0 }
  0xda   :  { %v386_v36 = vadd.f32 %v385_v57, %v317_v60 }
  0xdc   :  { %v422_v2 = vpop.f32.mrf.mxu1 }
  0xdd   :  { %v423_v38 = vadd.f32 %v422_v2, %v386_v36  ;;  %v463_v41 = vpop.f32.mrf.mxu2 }
  0xdf   :  { %v464_v61 = vadd.f32 %v463_v41, %v423_v38 }
  0xe0   :  { %v564_v16 = vpop.f32.mrf.mxu3 }
  0xe1   :  { %v565_v14 = vadd.f32 %v564_v16, %v464_v61 }
  0xed   :  { %v618_v37 = vpop.f32.mrf.mxu0 }
  0xee   :  { %v619_v4 = vadd.f32 %v618_v37, %v565_v14 }
  0xf4   :  { %v657_v15 = vpop.f32.mrf.mxu1 }
  0xf5   :  { %v658_v29 = vadd.f32 %v657_v15, %v619_v4 }
  0xf7   :  { %v726_v18 = vpop.f32.mrf.mxu2 }
  0xf8   :  { %v727_v47 = vadd.f32 %v726_v18, %v658_v29 }
  0xf9   :  { %v763_v42 = vpop.f32.mrf.mxu3 }
  0xfa   :  { %v764_v45 = vadd.f32 %v763_v42, %v727_v47 }
  0xfc   :  { %766 = vst [vmem:[#allocation7] sm:$0x1] %v764_v45 }
  0xfd   :  { %777 = dma.vmem_to_hbm [thread:$0]  %s773_s24, 16, %s775_s27, [#allocation4]  }
  0xfe   :  { %866 = dma.done.wait [#allocation4], 16  }
  0xff   :  { %867 = vsyncadd [#allocation4], 4294967280 }
 0x100   :  { %782 = vsyncpa [#allocation3], 1 }
 0x101   :  { %783 = vsyncpa [#allocation6], 1 }
 0x102   :  { %784 = vsyncpa [#allocation4], 1 }

</bundles_post_ra>
